<compile_context>
chip_gen: v5e
topology: v5e:2x2
jax: 0.10.0
libtpu: 0.0.40
codegen_flags: <defaults>
</compile_context>

<pallas_src>
import functools
import math

import jax
import jax.numpy as jnp
from jax.experimental import pallas as pl
from jax.experimental.pallas import tpu as pltpu


# ----------------------------------------------------------------------------
# generation-aware budgets
# ----------------------------------------------------------------------------
def _tpu_vmem_capacity_bytes():
    try:
        return int(pltpu.get_tpu_info().vmem_capacity_bytes)
    except Exception:
        return 64 * 1024 * 1024          # conservative default (v7x per-TC)


_VMEM_CAP = _tpu_vmem_capacity_bytes()
# Half of physical, clamped to [32 MiB, 96 MiB]: 64 MiB on v5e/v6e, 32 MiB on v7x.
_VMEM_LIMIT_BYTES = int(min(96 * 1024 * 1024, max(32 * 1024 * 1024, _VMEM_CAP // 2)))

if _VMEM_CAP >= 128 * 1024 * 1024:       # v5e / v6e: 128 MiB VMEM
    _MAX_TM, _MAX_TN, _MAX_TK = 512, 1024, 1024
else:                                     # v7x: 64 MiB per TensorCore
    _MAX_TM, _MAX_TN, _MAX_TK = 256, 512, 512


def _pick_tile(dim, max_tile, *, aligns=(256, 128, 8)):
    """Largest aligned divisor of `dim` that is <= max_tile.

    Small dims (<= max_tile) use the full extent (always layout-legal).
    Preference order: multiples of 256 (MXU width), then 128 (lane width),
    then 8 (sublane) for row axes only.
    """
    if dim <= max_tile:
        return dim
    for align in aligns:
        t = (max_tile // align) * align
        while t >= align:
            if dim % t == 0:
                return t
            t -= align
    # TODO(synk): ragged dims — use a pl.cdiv grid + masked epilogue instead of
    # a full-extent block (a full K/N block can blow VMEM on v7x).
    return dim


# ----------------------------------------------------------------------------
# Linear: y = act(x @ W + b) [+ residual], bf16 MXU operands, f32 accumulation
# ----------------------------------------------------------------------------
def _linear_kernel(x_ref, w_ref, b_ref, o_ref, acc_ref, *, activation):
    k = pl.program_id(2)

    @pl.when(k == 0)
    def _():
        acc_ref[...] = jnp.zeros_like(acc_ref)

    x = x_ref[...]
    if x.dtype != jnp.bfloat16:           # static; normally already bf16
        x = x.astype(jnp.bfloat16)
    acc_ref[...] += jnp.dot(x, w_ref[...], preferred_element_type=jnp.float32)

    @pl.when(k == pl.num_programs(2) - 1)
    def _():
        y = acc_ref[...] + b_ref[...].astype(jnp.float32)
        if activation == "relu":
            y = jnp.maximum(y, 0.0)
        o_ref[...] = y.astype(o_ref.dtype)


def _linear_residual_kernel(x_ref, w_ref, b_ref, r_ref, o_ref, acc_ref):
    k = pl.program_id(2)

    @pl.when(k == 0)
    def _():
        acc_ref[...] = jnp.zeros_like(acc_ref)

    x = x_ref[...]
    if x.dtype != jnp.bfloat16:
        x = x.astype(jnp.bfloat16)
    acc_ref[...] += jnp.dot(x, w_ref[...], preferred_element_type=jnp.float32)

    @pl.when(k == pl.num_programs(2) - 1)
    def _():
        y = (acc_ref[...]
             + b_ref[...].astype(jnp.float32)
             + r_ref[...].astype(jnp.float32))
        o_ref[...] = y.astype(o_ref.dtype)


def linear(x, w_bf16, b, *, residual=None, activation=None,
           out_dtype=jnp.float32):
    """x: (M, K) bf16/f32, w_bf16: (K, N) bf16, b: (N,) f32, residual: (M, N) f32."""
    M, K = x.shape
    K2, N = w_bf16.shape
    assert K == K2

    tm = _pick_tile(M, _MAX_TM, aligns=(256, 128, 8))
    tn = _pick_tile(N, _MAX_TN, aligns=(256, 128))
    tk = _pick_tile(K, _MAX_TK, aligns=(256, 128))
    # v7x has 2 TensorCores sharded over "parallel" grid axes; make sure at
    # least one parallel axis has >= 2 blocks so the second core gets work.
    if (M // tm) == 1 and (N // tn) == 1 and M % 16 == 0:
        tm = M // 2
    grid = (M // tm, N // tn, K // tk)          # reduction axis (k) last

    b2 = b.reshape(1, N)

    # The weight tile is the only operand whose block changes every k step;
    # give it a third buffer when the K grid is deep enough to benefit.
    if grid[2] >= 3:
        w_spec = pl.BlockSpec((tk, tn), lambda i, j, k: (k, j),
                              pipeline_mode=pl.Buffered(3))
    else:
        w_spec = pl.BlockSpec((tk, tn), lambda i, j, k: (k, j))

    in_specs = [
        pl.BlockSpec((tm, tk), lambda i, j, k: (i, k)),   # activations
        w_spec,                                           # weights
        pl.BlockSpec((1, tn), lambda i, j, k: (0, j)),    # bias row
    ]
    inputs = [x, w_bf16, b2]

    if residual is not None:
        in_specs.append(pl.BlockSpec((tm, tn), lambda i, j, k: (i, j)))
        inputs.append(residual)
        kernel = _linear_residual_kernel
    else:
        kernel = functools.partial(_linear_kernel, activation=activation)

    bytes_accessed = (x.size * x.dtype.itemsize
                      + w_bf16.size * w_bf16.dtype.itemsize
                      + b2.size * b2.dtype.itemsize
                      + M * N * jnp.dtype(out_dtype).itemsize)
    if residual is not None:
        bytes_accessed += residual.size * residual.dtype.itemsize

    return pl.pallas_call(
        kernel,
        out_shape=jax.ShapeDtypeStruct((M, N), out_dtype),
        grid_spec=pltpu.PrefetchScalarGridSpec(
            num_scalar_prefetch=0,
            grid=grid,
            in_specs=in_specs,
            out_specs=pl.BlockSpec((tm, tn), lambda i, j, k: (i, j)),
            scratch_shapes=[pltpu.VMEM((tm, tn), jnp.float32)],
        ),
        compiler_params=pltpu.CompilerParams(
            dimension_semantics=("parallel", "parallel", "arbitrary"),
            vmem_limit_bytes=_VMEM_LIMIT_BYTES,
        ),
        cost_estimate=pl.CostEstimate(
            flops=2 * M * K * N,
            transcendentals=0,
            bytes_accessed=int(bytes_accessed),
        ),
    )(*inputs)


# ----------------------------------------------------------------------------
# LayerNorm with module semantics: unbiased std (ddof=1), eps added to std.
# Output stored in bf16 (it is only ever consumed as an MXU operand).
# ----------------------------------------------------------------------------
def _layernorm_kernel(x_ref, g_ref, b_ref, o_ref, *, eps):
    x = x_ref[...].astype(jnp.float32)
    d = x.shape[-1]
    mean = jnp.mean(x, axis=-1, keepdims=True)
    xc = x - mean
    denom = max(d - 1, 1)                                        # torch x.std()
    std = jnp.sqrt(jnp.sum(xc * xc, axis=-1, keepdims=True) / denom)
    y = g_ref[...].astype(jnp.float32) * xc / (std + eps) \
        + b_ref[...].astype(jnp.float32)
    o_ref[...] = y.astype(o_ref.dtype)


def layernorm(x, gamma, beta, *, eps=1e-6, out_dtype=jnp.bfloat16):
    """x: (M, D) f32, gamma/beta: (D,) f32 -> (M, D) out_dtype."""
    M, D = x.shape
    tm = _pick_tile(M, _MAX_TM, aligns=(256, 128, 8))
    if (M // tm) == 1 and M % 16 == 0:
        tm = M // 2                      # keep both v7x TensorCores busy
    # Keep the double-buffered (f32 in + bf16 out) row tile within budget.
    while (tm >= 16 and tm * D * 12 > _VMEM_LIMIT_BYTES
           and M % (tm // 2) == 0 and (tm // 2) % 8 == 0):
        tm //= 2

    bytes_accessed = (M * D * (x.dtype.itemsize + jnp.dtype(out_dtype).itemsize)
                      + 2 * D * 4)
    return pl.pallas_call(
        functools.partial(_layernorm_kernel, eps=eps),
        out_shape=jax.ShapeDtypeStruct((M, D), out_dtype),
        grid_spec=pltpu.PrefetchScalarGridSpec(
            num_scalar_prefetch=0,
            grid=(M // tm,),
            in_specs=[
                pl.BlockSpec((tm, D), lambda i: (i, 0)),
                pl.BlockSpec((1, D), lambda i: (0, 0)),
                pl.BlockSpec((1, D), lambda i: (0, 0)),
            ],
            out_specs=pl.BlockSpec((tm, D), lambda i: (i, 0)),
        ),
        compiler_params=pltpu.CompilerParams(
            dimension_semantics=("parallel",),
            vmem_limit_bytes=_VMEM_LIMIT_BYTES,
        ),
        cost_estimate=pl.CostEstimate(
            flops=10 * M * D,
            transcendentals=M,
            bytes_accessed=int(bytes_accessed),
        ),
    )(x, gamma.reshape(1, D), beta.reshape(1, D))


# ----------------------------------------------------------------------------
# Self-attention: one batch per grid step, all heads per step.
# Reads a lane-dense (S, 3*D) qkv block straight from the fused-QKV matmul
# output and writes a lane-dense (S, D) block into the (M, D) output — the
# head split/merge happens in-kernel via static lane slices (no XLA transpose
# or split kernels, no extra HBM round trips).
# ----------------------------------------------------------------------------
def _attention_kernel(qkv_ref, o_ref, *, num_heads, d_model, scale):
    D, H = d_model, num_heads
    dk = D // H
    x = qkv_ref[...]                                      # (S, 3D) bf16
    heads = []
    for h in range(H):                                    # static unroll
        q = x[:, h * dk:(h + 1) * dk]                     # (S, dk)
        k = x[:, D + h * dk:D + (h + 1) * dk]
        v = x[:, 2 * D + h * dk:2 * D + (h + 1) * dk]
        # scores = q @ k^T (contract last dims; no explicit transpose)
        s = jax.lax.dot_general(q, k, (((1,), (1,)), ((), ())),
                                preferred_element_type=jnp.float32) * scale
        m = jnp.max(s, axis=-1, keepdims=True)
        p = jnp.exp(s - m)
        l = jnp.sum(p, axis=-1, keepdims=True)
        p = p * pl.reciprocal(l, approx=True)             # EUP, off the divide path
        heads.append(jnp.dot(p.astype(jnp.bfloat16), v,
                             preferred_element_type=jnp.float32))
    o = jnp.concatenate(heads, axis=-1)                   # (S, D), lane-dense store
    o_ref[...] = o.astype(o_ref.dtype)


def self_attention(qkv, *, batch, seq, num_heads, out_dtype=jnp.bfloat16):
    """qkv: (B*S, 3*D) bf16 -> (B*S, D) out_dtype."""
    M, threeD = qkv.shape
    D = threeD // 3
    dk = D // num_heads
    scale = 1.0 / math.sqrt(dk)

    bytes_accessed = M * threeD * qkv.dtype.itemsize \
        + M * D * jnp.dtype(out_dtype).itemsize
    return pl.pallas_call(
        functools.partial(_attention_kernel, num_heads=num_heads,
                          d_model=D, scale=scale),
        out_shape=jax.ShapeDtypeStruct((M, D), out_dtype),
        grid_spec=pltpu.PrefetchScalarGridSpec(
            num_scalar_prefetch=0,
            grid=(batch,),
            in_specs=[pl.BlockSpec((seq, threeD), lambda b: (b, 0))],
            out_specs=pl.BlockSpec((seq, D), lambda b: (b, 0)),
        ),
        compiler_params=pltpu.CompilerParams(
            dimension_semantics=("parallel",),
            vmem_limit_bytes=_VMEM_LIMIT_BYTES,
        ),
        cost_estimate=pl.CostEstimate(
            flops=4 * batch * seq * seq * D,
            transcendentals=batch * num_heads * seq * seq,
            bytes_accessed=int(bytes_accessed),
        ),
    )(qkv)


# ----------------------------------------------------------------------------
# EncoderLayer forward (dropout == identity at inference)
# ----------------------------------------------------------------------------
def encoder_layer_forward(x, params, *, num_heads, eps=1e-6):
    B, S, D = x.shape
    M = B * S
    x2 = x.reshape(M, D).astype(jnp.float32)              # residual stream, f32

    # ---- sublayer 0: x + SelfAttn(LayerNorm1(x)) ----
    xn = layernorm(x2, params["ln1_g"], params["ln1_b"], eps=eps)           # bf16
    qkv = linear(xn, params["w_qkv"], params["b_qkv"],
                 out_dtype=jnp.bfloat16)                                    # (M,3D) bf16
    o = self_attention(qkv, batch=B, seq=S, num_heads=num_heads)            # (M,D) bf16
    x1 = linear(o, params["w_o"], params["b_o"], residual=x2)               # f32

    # ---- sublayer 1: x1 + FFN(LayerNorm2(x1)) ----
    xn2 = layernorm(x1, params["ln2_g"], params["ln2_b"], eps=eps)          # bf16
    h = linear(xn2, params["w_ff1"], params["b_ff1"], activation="relu",
               out_dtype=jnp.bfloat16)                                      # bf16
    out = linear(h, params["w_ff2"], params["b_ff2"], residual=x1)          # f32

    return out.reshape(B, S, D)


# ----------------------------------------------------------------------------
# Pure-JAX f32 reference (module semantics), for correctness check
# ----------------------------------------------------------------------------
def encoder_layer_reference(x, params, *, num_heads, eps=1e-6):
    B, S, D = x.shape
    H = num_heads
    dk = D // H

    def ln(t, g, b):
        mean = t.mean(-1, keepdims=True)
        xc = t - mean
        std = jnp.sqrt((xc * xc).sum(-1, keepdims=True) / (t.shape[-1] - 1))
        return g * xc / (std + eps) + b

    def f32(w):
        return w.astype(jnp.float32)

    xn = ln(x, params["ln1_g"], params["ln1_b"])
    qkv = xn @ f32(params["w_qkv"]) + params["b_qkv"]
    q, k, v = jnp.split(qkv, 3, axis=-1)

    def to_heads(t):
        return t.reshape(B, S, H, dk).transpose(0, 2, 1, 3)

    q, k, v = to_heads(q), to_heads(k), to_heads(v)
    s = jnp.einsum("bhqd,bhkd->bhqk", q, k) / jnp.sqrt(jnp.float32(dk))
    p = jax.nn.softmax(s, axis=-1)
    o = jnp.einsum("bhqk,bhkd->bhqd", p, v)
    o = o.transpose(0, 2, 1, 3).reshape(B, S, D)
    x1 = x + (o @ f32(params["w_o"]) + params["b_o"])

    xn2 = ln(x1, params["ln2_g"], params["ln2_b"])
    h = jax.nn.relu(xn2 @ f32(params["w_ff1"]) + params["b_ff1"])
    return x1 + (h @ f32(params["w_ff2"]) + params["b_ff2"])


if __name__ == "__main__":
    # Small shapes consistent with the module: batch=2, seq=8, d_model=32, heads=4
    B, S, D, H = 2, 8, 32, 4
    d_ff = 4 * D  # 128 -> lane-dense FFN hidden

    key = jax.random.PRNGKey(0)
    kx, kp = jax.random.split(key)
    x = jax.random.normal(kx, (B, S, D), dtype=jnp.float32)

    def init_linear(kw, kb, fan_in, fan_out):
        bound = 1.0 / math.sqrt(fan_in)
        w = jax.random.uniform(kw, (fan_in, fan_out),
                               minval=-bound, maxval=bound, dtype=jnp.float32)
        b = jax.random.uniform(kb, (fan_out,),
                               minval=-bound, maxval=bound, dtype=jnp.float32)
        # weight stream stored in bf16 (kernel + reference use the same values)
        return w.astype(jnp.bfloat16), b

    kq, kqb, ko, kob, k1, k1b, k2, k2b = jax.random.split(kp, 8)
    w_qkv, b_qkv = init_linear(kq, kqb, D, 3 * D)
    w_o, b_o = init_linear(ko, kob, D, D)
    w_ff1, b_ff1 = init_linear(k1, k1b, D, d_ff)
    w_ff2, b_ff2 = init_linear(k2, k2b, d_ff, D)

    params = dict(
        ln1_g=jnp.ones((D,), jnp.float32), ln1_b=jnp.zeros((D,), jnp.float32),
        ln2_g=jnp.ones((D,), jnp.float32), ln2_b=jnp.zeros((D,), jnp.float32),
        w_qkv=w_qkv, b_qkv=b_qkv, w_o=w_o, b_o=b_o,
        w_ff1=w_ff1, b_ff1=b_ff1, w_ff2=w_ff2, b_ff2=b_ff2,
    )

    y = encoder_layer_forward(x, params, num_heads=H)
    y = jax.block_until_ready(y)

    y_ref = encoder_layer_reference(x, params, num_heads=H)
    assert y.shape == (B, S, D)
    assert jnp.allclose(y, y_ref, atol=5e-2, rtol=5e-2), \
        float(jnp.max(jnp.abs(y - y_ref)))

    print("KERNEL_OK")
</pallas_src>

<mosaic_0001>
module attributes {stable_mosaic.version = 11 : i64} {
  func.func @_layernorm_kernel(%arg0: i32, %arg1: memref<8x32xf32, #tpu.memory_space<vmem>>, %arg2: memref<1x32xf32, #tpu.memory_space<vmem>>, %arg3: memref<1x32xf32, #tpu.memory_space<vmem>>, %arg4: memref<8x32xbf16, #tpu.memory_space<vmem>>) attributes {dimension_semantics = [#tpu.dimension_semantics<parallel>], iteration_bounds = array<i64: 2>, scalar_prefetch = 0 : i64, scratch_operands = 0 : i64, tpu.core_type = #tpu.core_type<tc>, window_params = [{transform_indices = @transform_0, window_bounds = array<i64: 8, 32>}, {pipeline_mode = #tpu.pipeline_mode<synchronous>, transform_indices = @transform_1, window_bounds = array<i64: 1, 32>}, {pipeline_mode = #tpu.pipeline_mode<synchronous>, transform_indices = @transform_2, window_bounds = array<i64: 1, 32>}, {transform_indices = @transform_3, window_bounds = array<i64: 8, 32>}]} {
    %c0 = arith.constant 0 : index
    %c0_0 = arith.constant 0 : index
    %0 = vector.load %arg1[%c0, %c0_0] : memref<8x32xf32, #tpu.memory_space<vmem>>, vector<8x32xf32>
    %cst = arith.constant dense<0.000000e+00> : vector<8xf32>
    %1 = vector.multi_reduction <add>, %0, %cst [1] : vector<8x32xf32> to vector<8xf32>
    %2 = vector.shape_cast %1 : vector<8xf32> to vector<8x1xf32>
    %cst_1 = arith.constant 3.200000e+01 : f32
    %3 = vector.broadcast %cst_1 : f32 to vector<8x1xf32>
    %4 = arith.divf %2, %3 : vector<8x1xf32>
    %5 = vector.broadcast %4 : vector<8x1xf32> to vector<8x32xf32>
    %6 = arith.subf %0, %5 : vector<8x32xf32>
    %7 = arith.mulf %6, %6 : vector<8x32xf32>
    %cst_2 = arith.constant dense<0.000000e+00> : vector<8xf32>
    %8 = vector.multi_reduction <add>, %7, %cst_2 [1] : vector<8x32xf32> to vector<8xf32>
    %9 = vector.shape_cast %8 : vector<8xf32> to vector<8x1xf32>
    %cst_3 = arith.constant 3.100000e+01 : f32
    %10 = vector.broadcast %cst_3 : f32 to vector<8x1xf32>
    %11 = arith.divf %9, %10 : vector<8x1xf32>
    %12 = math.sqrt %11 : vector<8x1xf32>
    %c0_4 = arith.constant 0 : index
    %c0_5 = arith.constant 0 : index
    %13 = vector.load %arg2[%c0_4, %c0_5] : memref<1x32xf32, #tpu.memory_space<vmem>>, vector<1x32xf32>
    %14 = vector.broadcast %13 : vector<1x32xf32> to vector<8x32xf32>
    %15 = arith.mulf %14, %6 : vector<8x32xf32>
    %cst_6 = arith.constant 9.99999997E-7 : f32
    %16 = vector.broadcast %cst_6 : f32 to vector<8x1xf32>
    %17 = arith.addf %12, %16 : vector<8x1xf32>
    %18 = vector.broadcast %17 : vector<8x1xf32> to vector<8x32xf32>
    %19 = arith.divf %15, %18 : vector<8x32xf32>
    %c0_7 = arith.constant 0 : index
    %c0_8 = arith.constant 0 : index
    %20 = vector.load %arg3[%c0_7, %c0_8] : memref<1x32xf32, #tpu.memory_space<vmem>>, vector<1x32xf32>
    %21 = vector.broadcast %20 : vector<1x32xf32> to vector<8x32xf32>
    %22 = arith.addf %19, %21 : vector<8x32xf32>
    %23 = arith.truncf %22 : vector<8x32xf32> to vector<8x32xbf16>
    %c0_9 = arith.constant 0 : index
    %c0_10 = arith.constant 0 : index
    %24 = vector.load %arg4[%c0_9, %c0_10] : memref<8x32xbf16, #tpu.memory_space<vmem>>, vector<8x32xbf16>
    tpu.vector_store %arg4[%c0_9, %c0_10], %23 {strides = array<i32>} : memref<8x32xbf16, #tpu.memory_space<vmem>>, vector<8x32xbf16>,
    return
  }
  func.func @transform_0(%arg0: i32) -> (i32, i32) {
    %c0_i32 = arith.constant 0 : i32
    %c0_i32_0 = arith.constant 0 : i32
    return %arg0, %c0_i32 : i32, i32
  }
  func.func @transform_1(%arg0: i32) -> (i32, i32) {
    %c0_i32 = arith.constant 0 : i32
    %c0_i32_0 = arith.constant 0 : i32
    %c0_i32_1 = arith.constant 0 : i32
    return %c0_i32, %c0_i32_0 : i32, i32
  }
  func.func @transform_2(%arg0: i32) -> (i32, i32) {
    %c0_i32 = arith.constant 0 : i32
    %c0_i32_0 = arith.constant 0 : i32
    %c0_i32_1 = arith.constant 0 : i32
    return %c0_i32, %c0_i32_0 : i32, i32
  }
  func.func @transform_3(%arg0: i32) -> (i32, i32) {
    %c0_i32 = arith.constant 0 : i32
    %c0_i32_0 = arith.constant 0 : i32
    return %arg0, %c0_i32 : i32, i32
  }
}

</mosaic_0001>

<bundles_post_ra>
// kernel: tpu_custom_call.1
= control target key start
LH: loop header
LB: loop body
LE: loop exit
PB: predicated region body
PF: predicated region fallthrough
CT: control target
= control target key end

     0   :  { %8 = vsyncpa [#allocation3], 0  ;;  %s748_s0 = inlined_call_operand.hbm [shape: f32[16,32], index: 0, kind: input, shape index: {}]   ;;  %s749_s1 = inlined_call_operand.hbm [shape: f32[1,32], index: 1, kind: input, shape index: {}]   ;;  %s750_s2 = inlined_call_operand.vmem [shape: f32[1,32], index: 2, kind: input, shape index: {}]   ;;  %s751_s3 = inlined_call_operand.hbm [shape: bf16[16,32], index: 3, kind: output, shape index: {}]  }
   0x1   :  { %10 = vsyncpa [#allocation3 + $0x1], 0 }
   0x2   :  { %11 = vsyncpa [#allocation6], 0 }
   0x3   :  { %12 = vsyncpa [#allocation4], 0 }
   0x4   :  { %14 = vsyncpa [#allocation4 + $0x1], 0  ;;  %s604_s12 = smov 0   ;;  %s606_s13 = smov 0  }
   0x5   :  { %s608_s14 = smov 0   ;;  %s610_s15 = smov 0  }
   0x6 LB: > { %s625_s16 = sadd.s32 4294967295, %s579_s15   ;;  %s366_s17 = sadd.s32 4294967294, %s579_s15   ;;  %s579_s15 = sphi %s610_s15, %s761_s15   ;;  %s575_s14 = sphi %s608_s14, %s760_s14   ;;  %s571_s13 = sphi %s606_s13, %s759_s13   ;;  %s567_s12 = sphi %s604_s12, %s758_s12  }
   0x7   : > { %p40_p0 = scmp.ne.s32.totalorder %s571_s13, %s567_s12  ;;  %p41_p1 = scmp.eq.s32.totalorder %s625_s16, 0 }
   0x8   : > { %p106_p2 = scmp.eq.s32.totalorder %s625_s16, 1  ;;  %p112_p3 = scmp.eq.s32.totalorder %s366_s17, 1 }
   0x9   : > { %p634_p4 = por %p41_p1, %p40_p0  ;;  %p367_p5 = scmp.ge.s32.totalorder %s579_s15, 1 }
   0xa   : > { %p639_p6 = por %p112_p3, %p40_p0  ;;  %p119_p7 = scmp.lt.s32.totalorder %s579_s15, 3 }
   0xb   : > { %s131_s22 = sshll.u32 %s749_s1, 4  ;;  %s581_s24 = smov [#allocation5]   ;;  %s132_s22 = int_to_ptr.hbm [resolvable:$true] %s131_s22 }
   0xc   : > { %p647_p8 = pnand %p367_p5, %p119_p7  ;;  %s133_s25 = sshll.u32 %s581_s24, 4  ;;  %s134_s25 = int_to_ptr.vmem [resolvable:$true] %s133_s25 }
   0xd   : > { %s657_s26 = sadd.s32 1, %s579_s15   ;;  %s27_s27 = sadd.s32 1, %s575_s14 }
   0xe   : > { %p388_p10 = pneg %p647_p8  ;;  %s24_s28 = ssub.s32 %s579_s15, %s657_s26 }
   0xf   : > { %p25_p12 = scmp.eq.s32.totalorder %s24_s28, 0  ;;  %p34_p13 = scmp.ne.s32.totalorder %s575_s14, %s571_s13 }
  0x10   : > { %p389_p11 = pnand %p388_p10, %p41_p1  ;;  %p35_p0 = scmp.eq.s32.totalorder %s579_s15, 0 }
  0x11   : > { %s666_s29 = scalar_select %p25_p12, %s575_s14, %s27_s27  }
  0x12   : > { %391 = dma.hbm_to_vmem [thread:$0]  (!%p389_p11), %s132_s22, 16, %s134_s25, [#allocation6]  }
  0x13   : > { %p670_p3 = por %p106_p2, %p34_p13  ;;  %p401_p5 = scmp.lt.s32.totalorder %s579_s15, 2 }
  0x14   : > { %s147_s4 = sand.u32 1, %s575_s14   ;;  %s371_s5 = sshll.u32 %s579_s15, 3 }
  0x15   : > { %p36_p7 = por %p35_p0, %p34_p13  ;;  %s370_s6 = sshll.u32 %s147_s4, 3 }
  0x16   : > { %s155_s9 = scalar_lea.hbm %s748_s0, %s371_s5  ;;  %s151_s11 = scalar_lea.vmem [#allocation2], %s370_s6 }
  0x17   : > { %s157_s10 = sshll.u32 %s155_s9, 4  ;;  %s159_s17 = sshll.u32 %s151_s11, 4  ;;  %s158_s10 = int_to_ptr.hbm [resolvable:$true] %s157_s10  ;;  %s160_s17 = int_to_ptr.vmem [resolvable:$true] %s159_s17 }
  0x18   : > { %p680_p10 = pnand %p401_p5, %p36_p7  ;;  %s148_s21 = scalar_lea.sflag [#allocation3], %s147_s4 }
  0x19   : > { %s479_s22 = sshra.s32 %s158_s10, 4  ;;  %s486_s28 = scalar_lea.hbm %s748_s0, 16  ;;  %s480_s22 = int_to_ptr.hbm [resolvable:$true] %s479_s22 }
  0x1a   : > { %s481_s24 = scalar_lea.hbm %s480_s22, 8  ;;  %p483_p11 = pneg %p680_p10 }
  0x1b   : > { %p482_p2 = scmp.ne.s32.totalorder %s480_s22, %s481_s24  ;;  %p487_p0 = scmp.lt.s32.totalorder %s480_s22, %s748_s0 }
  0x1c   : > { %p488_p5 = scmp.lt.s32.totalorder %s486_s28, %s481_s24 }
  0x1d   : > { %p484_p12 = pnand %p483_p11, %p482_p2 }
  0x1e   : > { %p489_p7 = por %p488_p5, %p487_p0 }
  0x1f   : > { %p485_p13 = pneg %p484_p12 }
  0x21   : > { %p490_p9 = pnand %p489_p7, %p485_p13 }
  0x23   : > { %493 = shalt.err (!%p490_p9)
}
  0x24   : > { %395 = dma.hbm_to_vmem [thread:$0]  (!%p680_p10), %s158_s10, 128, %s160_s17, %s148_s21  }
  0x25   : > { %168 = sbr.rel (%p647_p8) target bundleno = 337 (0x151), region = 32  ;;  %s697_s4 = sand.u32 (!%p647_p8), 1, %s571_s13  }
  0x26   : > { %s373_s7 = sshll.u32 (!%p647_p8), %s697_s4, 3  ;;  %s171_s8 = scalar_lea.sflag (!%p647_p8), [#allocation3], %s697_s4 }
  0x27   : > { %s174_s9 = scalar_lea.vmem (!%p647_p8), [#allocation2], %s373_s7 }
  0x2a   : > { %554 = dma.done.wait (%p634_p4), %s171_s8, 128  }
  0x2b   : > { %556 = vsyncadd (%p634_p4), %s171_s8, 4294967168 }
  0x2c   : > { %558 = dma.done.wait (%p41_p1), [#allocation6], 16  }
  0x2d   : > { %560 = vsyncadd (%p41_p1), [#allocation6], 4294967280  ;;  %vm204_vm0 = vcmask 261120   ;;  %v203_v0 = vld [vmem:[%s174_s9] sm:$0xff]  ;;  %v582_v2 = vmov 32.0   ;;  %v583_v14 = vmov 31.0  }
  0x2e   : > { %v205_v1 = vsel %vm204_vm0, %v203_v0, 0.0  ;;  %441 = vrcp.f32 %v582_v2  ;;  %v439_v38 = vld [vmem:[#allocation5] ss:$0 sm:$0xff]  ;;  %s375_s18 = sshll.u32 %s697_s4, 2  ;;  %s377_s23 = sshll.u32 %s625_s16, 2  ;;  %vm268_vm9 = vcmask 257024  }
  0x2f   : > { %206 = vadd.xlane.f32.xlu0 %v205_v1  ;;  %443 = vrcp.f32 %v583_v14  ;;  %v440_v45 = vld [vmem:[%s750_s2] ss:$0 sm:$0xff]  ;;  %s281_s21 = scalar_lea.hbm %s751_s3, %s377_s23  ;;  %s202_s16 = scalar_lea.vmem [#allocation7], %s375_s18 }
  0x30   : > { %s283_s22 = sshll.u32 %s202_s16, 4  ;;  %s285_s24 = sshll.u32 %s281_s21, 4  ;;  %s284_s22 = int_to_ptr.vmem [resolvable:$true] %s283_s22  ;;  %s286_s24 = int_to_ptr.hbm [resolvable:$true] %s285_s24 }
  0x31   : > { %s271_s25 = scalar_lea.sflag [#allocation4], %s697_s4  ;;  %s523_s27 = sshra.s32 %s286_s24, 4  ;;  %s524_s27 = int_to_ptr.hbm [resolvable:$true] %s523_s27 }
  0x32   : > { %s525_s28 = scalar_lea.hbm %s524_s27, 4  ;;  %s529_s7 = scalar_lea.hbm %s751_s3, 8 }
  0x33   : > { %p526_p1 = scmp.ne.s32.totalorder %s524_s27, %s525_s28  ;;  %p530_p9 = scmp.lt.s32.totalorder %s524_s27, %s751_s3 }
  0x34   : > { %v442_v3 = vpop.eup %441  ;;  %p531_p10 = scmp.lt.s32.totalorder %s529_s7, %s525_s28 }
  0x35   : > { %v209_v4 = vmul.f32 32.0, %v442_v3  ;;  %vm213_vm1 = vweird.f32 %v442_v3  ;;  %v444_v15 = vpop.eup %443  ;;  %p527_p4 = pnand %p526_p1, %p670_p3 }
  0x36   : > { %v222_v16 = vmul.f32 31.0, %v444_v15  ;;  %vm226_vm2 = vweird.f32 %v444_v15  ;;  %p532_p2 = por %p531_p10, %p530_p9 }
  0x37   : > { %v210_v5 = vsub.f32 1.0, %v209_v4  ;;  %p528_p8 = pneg %p527_p4 }
  0x38   : > { %v223_v17 = vsub.f32 1.0, %v222_v16 }
  0x39   : > { %v211_v6 = vmul.f32 %v442_v3, %v210_v5  ;;  %p533_p11 = pnand %p532_p2, %p528_p8 }
  0x3a   : > { %v224_v18 = vmul.f32 %v444_v15, %v223_v17 }
  0x3b   : > { %v212_v7 = vadd.f32 %v442_v3, %v211_v6 }
  0x3c   : > { %v225_v19 = vadd.f32 %v444_v15, %v224_v18 }
  0x3d   : > { %v214_v8 = vsel %vm213_vm1, %v442_v3, %v212_v7 }
  0x3e   : > { %v227_v20 = vsel %vm226_vm2, %v444_v15, %v225_v19 }
  0xa2   : > { %v207_v9 = vpop.xlane.xlu0 %206 }
  0xa3   : > { %v215_v10 = vmul.f32 %v214_v8, %v207_v9 }
  0xa5   : > { %v216_v11 = vsub.f32 %v203_v0, %v215_v10 }
  0xa7   : > { %v217_v12 = vmul.f32 %v216_v11, %v216_v11  ;;  %v245_v43 = vmul.f32 %v439_v38, %v216_v11 }
  0xa9   : > { %v218_v13 = vsel %vm204_vm0, %v217_v12, 0.0 }
  0xaa   : > { %219 = vadd.xlane.f32.xlu0 %v218_v13 }
 0x11d   : > { %v220_v21 = vpop.xlane.xlu0 %219 }
 0x11e   : > { %v228_v22 = vmul.f32 %v227_v20, %v220_v21 }
 0x120   : > { %445 = vrsqrt.f32 %v228_v22  ;;  %vm236_vm3 = vcmp.eq.f32.partialorder %v228_v22, inf  ;;  %v239_v30 = vand.u32 2147483648, %v228_v22  ;;  %vm238_vm4 = vcmp.eq.f32.partialorder %v228_v22, 0.0 }
 0x126   : > { %v446_v23 = vpop.eup %445 }
 0x127   : > { %v230_v24 = vmul.f32 %v446_v23, %v228_v22 }
 0x129   : > { %v231_v25 = vmul.f32 %v446_v23, %v230_v24 }
 0x12b   : > { %v232_v26 = vmul.f32 0.5, %v231_v25 }
 0x12d   : > { %v233_v27 = vsub.f32 1.5, %v232_v26 }
 0x12f   : > { %v234_v28 = vmul.f32 %v446_v23, %v233_v27 }
 0x131   : > { %v235_v29 = vmul.f32 %v234_v28, %v228_v22 }
 0x133   : > { %v237_v31 = vsel %vm236_vm3, %v228_v22, %v235_v29 }
 0x134   : > { %v240_v32 = vsel %vm238_vm4, %v239_v30, %v237_v31 }
 0x135   : > { %v246_v33 = vadd.f32 1e-06, %v240_v32 }
 0x137   : > { %447 = vrcp.f32 %v246_v33  ;;  %v258_v37 = vand.u32 2147483648, %v246_v33  ;;  %v256_v40 = vand.u32 2147483647, %v246_v33  ;;  %vm252_vm6 = vweird.f32 %v246_v33 }
 0x139   : > { %v259_v42 = vor.u32 1.1754944e-38, %v258_v37  ;;  %vm257_vm8 = vcmp.eq.f32.partialorder %v256_v40, 8.507059e+37 }
 0x13d   : > { %v448_v34 = vpop.eup %447 }
 0x13e   : > { %v248_v35 = vmul.f32 %v448_v34, %v246_v33  ;;  %vm253_vm5 = vweird.f32 %v448_v34 }
 0x13f   : > { %vm254_vm7 = vmor %vm252_vm6, %vm253_vm5 }
 0x140   : > { %v249_v36 = vsub.f32 1.0, %v248_v35 }
 0x142   : > { %v250_v39 = vmul.f32 %v448_v34, %v249_v36 }
 0x144   : > { %v251_v41 = vadd.f32 %v448_v34, %v250_v39 }
 0x146   : > { %v255_v44 = vsel %vm254_vm7, %v448_v34, %v251_v41 }
 0x147   : > { %v260_v46 = vsel %vm257_vm8, %v259_v42, %v255_v44 }
 0x148   : > { %v261_v47 = vmul.f32 %v260_v46, %v245_v43 }
 0x14a   : > { %v266_v48 = vadd.f32 %v440_v45, %v261_v47 }
 0x14c   : > { %v267_v49 = vpack.c.bf16 %v266_v48, %v266_v48 }
 0x14e   : > { %269 = vst.msk [vmem:[%s202_s16] sm:$0xf] %vm268_vm9, %v267_v49 }
 0x14f   : > { %536 = shalt.err (!%p533_p11)
}
 0x150   : > { %386 = dma.vmem_to_hbm [thread:$0]  (%p670_p3), %s284_s22, 64, %s286_s24, %s271_s25  }
 0x151 PF: > { %s297_s4 = sand.u32 1, %s567_s12   ;;  %p757_p12 = scmp.ge.s32.totalorder %s579_s15, 2 }
 0x152   : > { %s298_s18 = scalar_lea.sflag [#allocation4], %s297_s4 }
 0x153   : > { %p397_p13 = pnand %p757_p12, %p639_p6 }
 0x155   : > { %p398_p0 = pneg %p397_p13 }
 0x157   : > { %562 = dma.done.wait (%p398_p0), %s298_s18, 64  }
 0x158   : > { %564 = vsyncadd (%p398_p0), %s298_s18, 4294967232  ;;  %p17_p5 = scmp.ge.s32.totalorder %s657_s26, 4   ;;  %s758_s12 = smov %s571_s13 }
 0x159   : > { %s759_s13 = smov %s575_s14  ;;  %s760_s14 = smov %s666_s29 }
 0x15a   : > { %s761_s15 = smov %s657_s26  ;;  %19 = sbr.rel (!%p17_p5) target bundleno = 6 (0x6), region = 81 }
 0x15f   :  { %304 = vsyncpa [#allocation3], 1 }
 0x160   :  { %306 = vsyncpa [#allocation3 + $0x1], 1 }
 0x161   :  { %307 = vsyncpa [#allocation6], 1 }
 0x162   :  { %308 = vsyncpa [#allocation4], 1 }
 0x163   :  { %310 = vsyncpa [#allocation4 + $0x1], 1 }

</bundles_post_ra>
